<compile_context>
chip_gen: v7x
topology: tpu7x:2x2x1
jax: 0.10.0
libtpu: 0.0.40
codegen_flags: <defaults>
</compile_context>

<pallas_src>
import functools

import jax
import jax.numpy as jnp
from jax import lax
from jax.experimental import pallas as pl
from jax.experimental.pallas import tpu as pltpu


def _round_up(n, m):
    return ((n + m - 1) // m) * m


# ----------------------------------------------------------------------------
# Kernel: each grid step processes a block of t_blk timesteps.
# Hidden state persists across grid steps in a VMEM scratch ("arbitrary" axis).
# ----------------------------------------------------------------------------
def _rnn_block_kernel(tok_ref, proj_ref, h0_ref, wh_ref, wd_ref, bd_ref,
                      out_ref, logits_ref, h_scratch, xproj_scratch):
    blk = pl.program_id(0)
    t_blk, bp, hp = xproj_scratch.shape
    vp = proj_ref.shape[0]
    n_tok = t_blk * bp

    @pl.when(blk == 0)
    def _():
        h_scratch[...] = h0_ref[...]

    # --- Fused embedding gather + input projection (off the serial path) ----
    # x_proj[t, b] = proj_table[x[t, b]]  with  proj_table = Emb @ Wx^T + b_h.
    # Realised as a one-hot matmul on the MXU (guaranteed TPU lowering); done
    # once per time block, so it is amortised over t_blk recurrent steps.
    # TODO(synk): for large vocabularies (table no longer VMEM-resident) switch
    # to a jnp.take / manual-DMA row gather instead of the one-hot matmul.
    ids = tok_ref[0]                                              # (n_tok, 1) int32
    onehot = (jax.lax.broadcasted_iota(jnp.int32, (n_tok, vp), 1)
              == ids).astype(proj_ref.dtype)                      # (n_tok, vp)
    xproj = jnp.dot(onehot, proj_ref[...],
                    preferred_element_type=jnp.float32)           # (n_tok, hp)
    xproj_scratch[...] = xproj.reshape(t_blk, bp, hp)

    wh = wh_ref[...]        # (hp, hp) bf16; loaded from VMEM once per block
    # TODO(synk): hold Wh in the MXU across timesteps (pltpu.matmul_push_rhs /
    # matmul_acc_lhs / matmul_pop) to shave the per-step serial MXU latency;
    # kept on jnp.dot here to guarantee correct accumulator semantics.

    def step(i, h):
        # h @ Wh^T on the MXU (bf16 inputs, f32 accumulation) + the
        # precomputed input projection (Wx and b_h already folded in).
        f = xproj_scratch[i] + jnp.dot(h.astype(wh.dtype), wh,
                                       preferred_element_type=jnp.float32)
        h_new = jnp.tanh(f)
        out_ref[i] = h_new.astype(out_ref.dtype)
        return h_new

    # Small static blocks -> full unroll for LLO visibility; cap it for large
    # time blocks to avoid instruction-stream / live-range bloat.
    h_final = lax.fori_loop(0, t_blk, step, h_scratch[...],
                            unroll=True if t_blk <= 16 else 8)
    h_scratch[...] = h_final

    # Fused decode: logits = h @ Wd^T + b_d.  Written every block (cheap); the
    # last block's value is what is written back to HBM.
    logits_ref[...] = (
        jnp.dot(h_final.astype(wd_ref.dtype), wd_ref[...],
                preferred_element_type=jnp.float32) + bd_ref[...]
    ).astype(logits_ref.dtype)


# ----------------------------------------------------------------------------
# One-time (per-model) setup: projection-table precompute, padding, bf16 cast.
# Hoisted off the per-call path -- these are constants w.r.t. forward inputs.
# ----------------------------------------------------------------------------
def prepare_rnn_params(emb_table, wx, wh, bh, wd, bd, *, recur_dtype=jnp.bfloat16):
    """Returns (proj_p, wh_p, wd_p, bd_p), all padded / cast, ready for the kernel.

    emb_table : (vocab, emb_dim)          == emb.weight
    wx        : (hidden, emb_dim)         == f_x.weight (no bias)
    wh        : (hidden, hidden)          == f_h.weight
    bh        : (hidden,)                 == f_h.bias
    wd        : (output, hidden)          == f_d.weight
    bd        : (output,)                 == f_d.bias
    """
    vocab = emb_table.shape[0]
    hidden = wh.shape[0]
    output = wd.shape[0]

    hp = _round_up(hidden, 128)   # lane dim (bump to 256 on v6e/v7x once hidden is large)
    op = _round_up(output, 128)
    vp = _round_up(vocab, 128)    # lane-dense one-hot gather operand

    # proj_table[v] = emb[v] @ Wx^T + b_h   (f32, computed exactly once)
    proj = emb_table @ wx.T + bh                               # (vocab, hidden)
    proj_p = jnp.zeros((vp, hp), jnp.float32).at[:vocab, :hidden].set(proj)

    # Recurrent / decode weights fed to the MXU as bf16 (f32 accumulation; the
    # carried hidden state and all elementwise math stay f32).  Use
    # recur_dtype=jnp.float32 if long-sequence accuracy matters more.
    wh_p = (jnp.zeros((hp, hp), jnp.float32)
            .at[:hidden, :hidden].set(wh.T).astype(recur_dtype))
    wd_p = (jnp.zeros((hp, op), jnp.float32)
            .at[:hidden, :output].set(wd.T).astype(recur_dtype))
    bd_p = jnp.zeros((1, op), jnp.float32).at[0, :output].set(bd)
    return proj_p, wh_p, wd_p, bd_p


# ----------------------------------------------------------------------------
# Per-call forward + decode (jit-friendly; only tiny h0/token padding per call)
# ----------------------------------------------------------------------------
def rnn_forward_and_decode(x_tokens, h0, proj, wh, wd, bd, *,
                           output_size, t_blk=None):
    """x_tokens: (length, batch) int ids; h0: (batch, hidden) f32.
    Returns (out, logits): (length, batch, hidden) f32, (batch, output) f32."""
    length, batch = x_tokens.shape
    hidden = h0.shape[1]
    vp, hp = proj.shape
    op = wd.shape[1]
    bp = _round_up(batch, 16)     # bf16 MXU LHS: (16,128) = one packed vreg

    if t_blk is None:             # prefer a few grid blocks so DMA overlaps compute
        t_blk = 1
        for cand in range(min(length, 16), 0, -1):
            if length % cand == 0:
                t_blk = cand
                break
    assert length % t_blk == 0
    n_blk = length // t_blk
    n_tok = t_blk * bp

    # Per-call prep (cheap): pad batch dim of tokens / h0 only.
    tok_p = (jnp.zeros((length, bp), jnp.int32)
             .at[:, :batch].set(x_tokens.astype(jnp.int32))
             .reshape(n_blk, n_tok, 1))
    h0_p = jnp.zeros((bp, hp), jnp.float32).at[:batch, :hidden].set(h0)

    grid_spec = pltpu.PrefetchScalarGridSpec(
        num_scalar_prefetch=0,
        grid=(n_blk,),
        in_specs=[
            pl.BlockSpec((1, n_tok, 1), lambda b: (b, 0, 0)),   # token ids block
            # Constant-index inputs below are DMA'd once and stay resident.
            # (On v7x with huge hidden sizes, add pipeline_mode=pl.Buffered(1).)
            pl.BlockSpec((vp, hp), lambda b: (0, 0)),           # proj table (f32)
            pl.BlockSpec((bp, hp), lambda b: (0, 0)),           # h0
            pl.BlockSpec((hp, hp), lambda b: (0, 0)),           # Wh^T (bf16)
            pl.BlockSpec((hp, op), lambda b: (0, 0)),           # Wd^T (bf16)
            pl.BlockSpec((1, op), lambda b: (0, 0)),            # b_d
        ],
        out_specs=(
            pl.BlockSpec((t_blk, bp, hp), lambda b: (b, 0, 0)),  # hidden states
            pl.BlockSpec((bp, op), lambda b: (0, 0)),            # logits
        ),
        scratch_shapes=[
            pltpu.VMEM((bp, hp), jnp.float32),          # carried hidden state
            pltpu.VMEM((t_blk, bp, hp), jnp.float32),   # per-block x_proj
        ],
    )

    # Scoped-VMEM ceiling sized from the working set (v5e default is 16 MiB);
    # capped at 64 MiB so the same configuration still fits v7x VMEM.
    working_set = (
        2 * n_tok * 4
        + 2 * t_blk * bp * hp * 4
        + 2 * vp * hp * 4
        + 2 * bp * hp * 4
        + 2 * hp * hp * wh.dtype.itemsize
        + 2 * hp * op * wd.dtype.itemsize
        + 2 * op * 4
        + 2 * bp * op * 4
        + bp * hp * 4
        + t_blk * bp * hp * 4
    )
    vmem_limit = int(min(max(32 * 1024 * 1024, 2 * working_set),
                         64 * 1024 * 1024))

    out_p, logits_p = pl.pallas_call(
        _rnn_block_kernel,
        out_shape=(
            jax.ShapeDtypeStruct((length, bp, hp), jnp.float32),
            jax.ShapeDtypeStruct((bp, op), jnp.float32),
        ),
        grid_spec=grid_spec,
        compiler_params=pltpu.CompilerParams(
            # The time-block axis carries the recurrence -> must stay serial.
            dimension_semantics=("arbitrary",),
            vmem_limit_bytes=vmem_limit,
        ),
    )(tok_p, proj, h0_p, wh, wd, bd)

    return out_p[:, :batch, :hidden], logits_p[:batch, :output_size]


# ----------------------------------------------------------------------------
# Pure-JAX (f32) reference for correctness check
# ----------------------------------------------------------------------------
def rnn_forward_ref(x_tokens, h0, emb_table, wx_t, wh_t, bh):
    length = x_tokens.shape[0]
    outs = []
    h = h0
    for t in range(length):
        e = emb_table[x_tokens[t]]
        h = jnp.tanh(e @ wx_t + h @ wh_t + bh)
        outs.append(h)
    return jnp.stack(outs, axis=0)


if __name__ == "__main__":
    # Small shapes consistent with the module's forward.
    input_size = 20      # vocab size
    embedding_dim = 16
    hidden_size = 32
    output_size = 10
    length, batch = 32, 4   # length=32, t_blk=8 -> 4 pipelined time blocks

    key = jax.random.PRNGKey(0)
    k_emb, k_wx, k_wh, k_bh, k_wd, k_bd, k_x, k_h = jax.random.split(key, 8)

    # Deterministic parameter init (synthetic; shapes match nn.Module __init__).
    emb_table = jax.random.normal(k_emb, (input_size, embedding_dim), jnp.float32) * 0.1
    wx = jax.random.normal(k_wx, (hidden_size, embedding_dim), jnp.float32) * 0.1   # f_x.weight
    wh = jax.random.normal(k_wh, (hidden_size, hidden_size), jnp.float32) * 0.1     # f_h.weight
    bh = jax.random.normal(k_bh, (hidden_size,), jnp.float32) * 0.1                 # f_h.bias
    wd = jax.random.normal(k_wd, (output_size, hidden_size), jnp.float32) * 0.1     # f_d.weight
    bd = jax.random.normal(k_bd, (output_size,), jnp.float32) * 0.1                 # f_d.bias

    x_tokens = jax.random.randint(k_x, (length, batch), 0, input_size, jnp.int32)
    h0 = jax.random.normal(k_h, (batch, hidden_size), jnp.float32)

    # One-time setup: projected table, padded / bf16-cast weights (hoisted out
    # of the per-call path).
    proj_p, wh_p, wd_p, bd_p = jax.block_until_ready(
        prepare_rnn_params(emb_table, wx, wh, bh, wd, bd))

    fwd = jax.jit(functools.partial(rnn_forward_and_decode,
                                    output_size=output_size, t_blk=8))
    out, logits = fwd(x_tokens, h0, proj_p, wh_p, wd_p, bd_p)
    out = jax.block_until_ready(out)
    logits = jax.block_until_ready(logits)

    # Verify against pure-f32 reference (bf16 MXU weights -> loose-ish atol,
    # still far below any structural error in the recurrence).
    ref = rnn_forward_ref(x_tokens, h0, emb_table, wx.T, wh.T, bh)
    ref_logits = ref[-1] @ wd.T + bd

    assert out.shape == (length, batch, hidden_size)
    assert logits.shape == (batch, output_size)
    assert jnp.allclose(out, ref, atol=3e-2, rtol=1e-2), float(jnp.abs(out - ref).max())
    assert jnp.allclose(logits, ref_logits, atol=3e-2, rtol=1e-2), \
        float(jnp.abs(logits - ref_logits).max())

    print("KERNEL_OK")
</pallas_src>

<mosaic_0001>
module attributes {stable_mosaic.version = 11 : i64} {
  func.func @_rnn_block_kernel(%arg0: i32, %arg1: memref<1x128x1xi32, #tpu.memory_space<vmem>>, %arg2: memref<128x128xf32, #tpu.memory_space<vmem>>, %arg3: memref<16x128xf32, #tpu.memory_space<vmem>>, %arg4: memref<128x128xbf16, #tpu.memory_space<vmem>>, %arg5: memref<128x128xbf16, #tpu.memory_space<vmem>>, %arg6: memref<1x128xf32, #tpu.memory_space<vmem>>, %arg7: memref<8x16x128xf32, #tpu.memory_space<vmem>>, %arg8: memref<16x128xf32, #tpu.memory_space<vmem>>, %arg9: memref<16x128xf32, #tpu.memory_space<vmem>>, %arg10: memref<8x16x128xf32, #tpu.memory_space<vmem>>) attributes {dimension_semantics = [#tpu.dimension_semantics<arbitrary>], iteration_bounds = array<i64: 4>, scalar_prefetch = 0 : i64, scratch_operands = 2 : i64, tpu.core_type = #tpu.core_type<tc>, window_params = [{transform_indices = @transform_0, window_bounds = array<i64: 1, 128, 1>}, {pipeline_mode = #tpu.pipeline_mode<synchronous>, transform_indices = @transform_1, window_bounds = array<i64: 128, 128>}, {pipeline_mode = #tpu.pipeline_mode<synchronous>, transform_indices = @transform_2, window_bounds = array<i64: 16, 128>}, {pipeline_mode = #tpu.pipeline_mode<synchronous>, transform_indices = @transform_3, window_bounds = array<i64: 128, 128>}, {pipeline_mode = #tpu.pipeline_mode<synchronous>, transform_indices = @transform_4, window_bounds = array<i64: 128, 128>}, {pipeline_mode = #tpu.pipeline_mode<synchronous>, transform_indices = @transform_5, window_bounds = array<i64: 1, 128>}, {transform_indices = @transform_6, window_bounds = array<i64: 8, 16, 128>}, {pipeline_mode = #tpu.pipeline_mode<synchronous>, transform_indices = @transform_7, window_bounds = array<i64: 16, 128>}]} {
    %c0_i32 = arith.constant 0 : i32
    %0 = arith.cmpi eq, %arg0, %c0_i32 : i32
    %1 = arith.extui %0 : i1 to i32
    %c0_i32_0 = arith.constant 0 : i32
    %2 = arith.cmpi ne, %1, %c0_i32_0 : i32
    scf.if %2 {
      %c0_62 = arith.constant 0 : index
      %c0_63 = arith.constant 0 : index
      %112 = vector.load %arg3[%c0_62, %c0_63] : memref<16x128xf32, #tpu.memory_space<vmem>>, vector<16x128xf32>
      %c0_64 = arith.constant 0 : index
      %c0_65 = arith.constant 0 : index
      %113 = vector.load %arg9[%c0_64, %c0_65] : memref<16x128xf32, #tpu.memory_space<vmem>>, vector<16x128xf32>
      tpu.vector_store %arg9[%c0_64, %c0_65], %112 {strides = array<i32>} : memref<16x128xf32, #tpu.memory_space<vmem>>, vector<16x128xf32>,
    } else {
    }
    %c0 = arith.constant 0 : index
    %c0_1 = arith.constant 0 : index
    %c0_2 = arith.constant 0 : index
    %3 = vector.load %arg1[%c0, %c0_1, %c0_2] : memref<1x128x1xi32, #tpu.memory_space<vmem>>, vector<1x128x1xi32>
    %4 = vector.shape_cast %3 : vector<1x128x1xi32> to vector<128x1xi32>
    %5 = tpu.iota {dimensions = array<i32: 1>} : vector<128x128xi32>
    %6 = vector.broadcast %4 : vector<128x1xi32> to vector<128x128xi32>
    %7 = arith.cmpi eq, %5, %6 : vector<128x128xi32>
    %8 = arith.extui %7 : vector<128x128xi1> to vector<128x128xi32>
    %9 = arith.sitofp %8 : vector<128x128xi32> to vector<128x128xf32>
    %c0_3 = arith.constant 0 : index
    %c0_4 = arith.constant 0 : index
    %10 = vector.load %arg2[%c0_3, %c0_4] : memref<128x128xf32, #tpu.memory_space<vmem>>, vector<128x128xf32>
    %cst = arith.constant dense<0.000000e+00> : vector<128x128xf32>
    %11 = tpu.matmul %9, %10, %cst {dimension_numbers = #tpu.dot_dimension_numbers<[1], [0], [0], [1], [0, 0, 1, 1], [], []>} : vector<128x128xf32>, vector<128x128xf32>, vector<128x128xf32> -> vector<128x128xf32>
    %12 = vector.shape_cast %11 : vector<128x128xf32> to vector<8x16x128xf32>
    %c0_5 = arith.constant 0 : index
    %c0_6 = arith.constant 0 : index
    %c0_7 = arith.constant 0 : index
    %13 = vector.load %arg10[%c0_5, %c0_6, %c0_7] : memref<8x16x128xf32, #tpu.memory_space<vmem>>, vector<8x16x128xf32>
    tpu.vector_store %arg10[%c0_5, %c0_6, %c0_7], %12 {strides = array<i32>} : memref<8x16x128xf32, #tpu.memory_space<vmem>>, vector<8x16x128xf32>,
    %c0_8 = arith.constant 0 : index
    %c0_9 = arith.constant 0 : index
    %14 = vector.load %arg4[%c0_8, %c0_9] : memref<128x128xbf16, #tpu.memory_space<vmem>>, vector<128x128xbf16>
    %c0_10 = arith.constant 0 : index
    %c0_11 = arith.constant 0 : index
    %15 = vector.load %arg9[%c0_10, %c0_11] : memref<16x128xf32, #tpu.memory_space<vmem>>, vector<16x128xf32>
    %c0_i32_12 = arith.constant 0 : i32
    %16 = arith.index_cast %c0_i32_12 : i32 to index
    %c0_13 = arith.constant 0 : index
    %c0_14 = arith.constant 0 : index
    %17 = vector.load %arg10[%16, %c0_13, %c0_14] : memref<8x16x128xf32, #tpu.memory_space<vmem>>, vector<1x16x128xf32>
    %18 = vector.shape_cast %17 : vector<1x16x128xf32> to vector<16x128xf32>
    %19 = arith.truncf %15 : vector<16x128xf32> to vector<16x128xbf16>
    %cst_15 = arith.constant dense<0.000000e+00> : vector<16x128xf32>
    %20 = tpu.matmul %19, %14, %cst_15 {dimension_numbers = #tpu.dot_dimension_numbers<[1], [0], [0], [1], [0, 0, 1, 1], [], []>} : vector<16x128xbf16>, vector<128x128xbf16>, vector<16x128xf32> -> vector<16x128xf32>
    %21 = arith.addf %18, %20 : vector<16x128xf32>
    %22 = math.tanh %21 : vector<16x128xf32>
    %23 = arith.index_cast %c0_i32_12 : i32 to index
    %c0_16 = arith.constant 0 : index
    %c0_17 = arith.constant 0 : index
    %24 = vector.load %arg7[%23, %c0_16, %c0_17] : memref<8x16x128xf32, #tpu.memory_space<vmem>>, vector<1x16x128xf32>
    %25 = vector.shape_cast %24 : vector<1x16x128xf32> to vector<16x128xf32>
    %26 = vector.shape_cast %22 : vector<16x128xf32> to vector<1x16x128xf32>
    tpu.vector_store %arg7[%23, %c0_16, %c0_17], %26 {strides = array<i32>} : memref<8x16x128xf32, #tpu.memory_space<vmem>>, vector<1x16x128xf32>,
    %c1_i32 = arith.constant 1 : i32
    %27 = arith.index_cast %c1_i32 : i32 to index
    %c0_18 = arith.constant 0 : index
    %c0_19 = arith.constant 0 : index
    %28 = vector.load %arg10[%27, %c0_18, %c0_19] : memref<8x16x128xf32, #tpu.memory_space<vmem>>, vector<1x16x128xf32>
    %29 = vector.shape_cast %28 : vector<1x16x128xf32> to vector<16x128xf32>
    %30 = arith.truncf %22 : vector<16x128xf32> to vector<16x128xbf16>
    %cst_20 = arith.constant dense<0.000000e+00> : vector<16x128xf32>
    %31 = tpu.matmul %30, %14, %cst_20 {dimension_numbers = #tpu.dot_dimension_numbers<[1], [0], [0], [1], [0, 0, 1, 1], [], []>} : vector<16x128xbf16>, vector<128x128xbf16>, vector<16x128xf32> -> vector<16x128xf32>
    %32 = arith.addf %29, %31 : vector<16x128xf32>
    %33 = math.tanh %32 : vector<16x128xf32>
    %34 = arith.index_cast %c1_i32 : i32 to index
    %c0_21 = arith.constant 0 : index
    %c0_22 = arith.constant 0 : index
    %35 = vector.load %arg7[%34, %c0_21, %c0_22] : memref<8x16x128xf32, #tpu.memory_space<vmem>>, vector<1x16x128xf32>
    %36 = vector.shape_cast %35 : vector<1x16x128xf32> to vector<16x128xf32>
    %37 = vector.shape_cast %33 : vector<16x128xf32> to vector<1x16x128xf32>
    tpu.vector_store %arg7[%34, %c0_21, %c0_22], %37 {strides = array<i32>} : memref<8x16x128xf32, #tpu.memory_space<vmem>>, vector<1x16x128xf32>,
    %c2_i32 = arith.constant 2 : i32
    %38 = arith.index_cast %c2_i32 : i32 to index
    %c0_23 = arith.constant 0 : index
    %c0_24 = arith.constant 0 : index
    %39 = vector.load %arg10[%38, %c0_23, %c0_24] : memref<8x16x128xf32, #tpu.memory_space<vmem>>, vector<1x16x128xf32>
    %40 = vector.shape_cast %39 : vector<1x16x128xf32> to vector<16x128xf32>
    %41 = arith.truncf %33 : vector<16x128xf32> to vector<16x128xbf16>
    %cst_25 = arith.constant dense<0.000000e+00> : vector<16x128xf32>
    %42 = tpu.matmul %41, %14, %cst_25 {dimension_numbers = #tpu.dot_dimension_numbers<[1], [0], [0], [1], [0, 0, 1, 1], [], []>} : vector<16x128xbf16>, vector<128x128xbf16>, vector<16x128xf32> -> vector<16x128xf32>
    %43 = arith.addf %40, %42 : vector<16x128xf32>
    %44 = math.tanh %43 : vector<16x128xf32>
    %45 = arith.index_cast %c2_i32 : i32 to index
    %c0_26 = arith.constant 0 : index
    %c0_27 = arith.constant 0 : index
    %46 = vector.load %arg7[%45, %c0_26, %c0_27] : memref<8x16x128xf32, #tpu.memory_space<vmem>>, vector<1x16x128xf32>
    %47 = vector.shape_cast %46 : vector<1x16x128xf32> to vector<16x128xf32>
    %48 = vector.shape_cast %44 : vector<16x128xf32> to vector<1x16x128xf32>
    tpu.vector_store %arg7[%45, %c0_26, %c0_27], %48 {strides = array<i32>} : memref<8x16x128xf32, #tpu.memory_space<vmem>>, vector<1x16x128xf32>,
    %c3_i32 = arith.constant 3 : i32
    %49 = arith.index_cast %c3_i32 : i32 to index
    %c0_28 = arith.constant 0 : index
    %c0_29 = arith.constant 0 : index
    %50 = vector.load %arg10[%49, %c0_28, %c0_29] : memref<8x16x128xf32, #tpu.memory_space<vmem>>, vector<1x16x128xf32>
    %51 = vector.shape_cast %50 : vector<1x16x128xf32> to vector<16x128xf32>
    %52 = arith.truncf %44 : vector<16x128xf32> to vector<16x128xbf16>
    %cst_30 = arith.constant dense<0.000000e+00> : vector<16x128xf32>
    %53 = tpu.matmul %52, %14, %cst_30 {dimension_numbers = #tpu.dot_dimension_numbers<[1], [0], [0], [1], [0, 0, 1, 1], [], []>} : vector<16x128xbf16>, vector<128x128xbf16>, vector<16x128xf32> -> vector<16x128xf32>
    %54 = arith.addf %51, %53 : vector<16x128xf32>
    %55 = math.tanh %54 : vector<16x128xf32>
    %56 = arith.index_cast %c3_i32 : i32 to index
    %c0_31 = arith.constant 0 : index
    %c0_32 = arith.constant 0 : index
    %57 = vector.load %arg7[%56, %c0_31, %c0_32] : memref<8x16x128xf32, #tpu.memory_space<vmem>>, vector<1x16x128xf32>
    %58 = vector.shape_cast %57 : vector<1x16x128xf32> to vector<16x128xf32>
    %59 = vector.shape_cast %55 : vector<16x128xf32> to vector<1x16x128xf32>
    tpu.vector_store %arg7[%56, %c0_31, %c0_32], %59 {strides = array<i32>} : memref<8x16x128xf32, #tpu.memory_space<vmem>>, vector<1x16x128xf32>,
    %c4_i32 = arith.constant 4 : i32
    %60 = arith.index_cast %c4_i32 : i32 to index
    %c0_33 = arith.constant 0 : index
    %c0_34 = arith.constant 0 : index
    %61 = vector.load %arg10[%60, %c0_33, %c0_34] : memref<8x16x128xf32, #tpu.memory_space<vmem>>, vector<1x16x128xf32>
    %62 = vector.shape_cast %61 : vector<1x16x128xf32> to vector<16x128xf32>
    %63 = arith.truncf %55 : vector<16x128xf32> to vector<16x128xbf16>
    %cst_35 = arith.constant dense<0.000000e+00> : vector<16x128xf32>
    %64 = tpu.matmul %63, %14, %cst_35 {dimension_numbers = #tpu.dot_dimension_numbers<[1], [0], [0], [1], [0, 0, 1, 1], [], []>} : vector<16x128xbf16>, vector<128x128xbf16>, vector<16x128xf32> -> vector<16x128xf32>
    %65 = arith.addf %62, %64 : vector<16x128xf32>
    %66 = math.tanh %65 : vector<16x128xf32>
    %67 = arith.index_cast %c4_i32 : i32 to index
    %c0_36 = arith.constant 0 : index
    %c0_37 = arith.constant 0 : index
    %68 = vector.load %arg7[%67, %c0_36, %c0_37] : memref<8x16x128xf32, #tpu.memory_space<vmem>>, vector<1x16x128xf32>
    %69 = vector.shape_cast %68 : vector<1x16x128xf32> to vector<16x128xf32>
    %70 = vector.shape_cast %66 : vector<16x128xf32> to vector<1x16x128xf32>
    tpu.vector_store %arg7[%67, %c0_36, %c0_37], %70 {strides = array<i32>} : memref<8x16x128xf32, #tpu.memory_space<vmem>>, vector<1x16x128xf32>,
    %c5_i32 = arith.constant 5 : i32
    %71 = arith.index_cast %c5_i32 : i32 to index
    %c0_38 = arith.constant 0 : index
    %c0_39 = arith.constant 0 : index
    %72 = vector.load %arg10[%71, %c0_38, %c0_39] : memref<8x16x128xf32, #tpu.memory_space<vmem>>, vector<1x16x128xf32>
    %73 = vector.shape_cast %72 : vector<1x16x128xf32> to vector<16x128xf32>
    %74 = arith.truncf %66 : vector<16x128xf32> to vector<16x128xbf16>
    %cst_40 = arith.constant dense<0.000000e+00> : vector<16x128xf32>
    %75 = tpu.matmul %74, %14, %cst_40 {dimension_numbers = #tpu.dot_dimension_numbers<[1], [0], [0], [1], [0, 0, 1, 1], [], []>} : vector<16x128xbf16>, vector<128x128xbf16>, vector<16x128xf32> -> vector<16x128xf32>
    %76 = arith.addf %73, %75 : vector<16x128xf32>
    %77 = math.tanh %76 : vector<16x128xf32>
    %78 = arith.index_cast %c5_i32 : i32 to index
    %c0_41 = arith.constant 0 : index
    %c0_42 = arith.constant 0 : index
    %79 = vector.load %arg7[%78, %c0_41, %c0_42] : memref<8x16x128xf32, #tpu.memory_space<vmem>>, vector<1x16x128xf32>
    %80 = vector.shape_cast %79 : vector<1x16x128xf32> to vector<16x128xf32>
    %81 = vector.shape_cast %77 : vector<16x128xf32> to vector<1x16x128xf32>
    tpu.vector_store %arg7[%78, %c0_41, %c0_42], %81 {strides = array<i32>} : memref<8x16x128xf32, #tpu.memory_space<vmem>>, vector<1x16x128xf32>,
    %c6_i32 = arith.constant 6 : i32
    %82 = arith.index_cast %c6_i32 : i32 to index
    %c0_43 = arith.constant 0 : index
    %c0_44 = arith.constant 0 : index
    %83 = vector.load %arg10[%82, %c0_43, %c0_44] : memref<8x16x128xf32, #tpu.memory_space<vmem>>, vector<1x16x128xf32>
    %84 = vector.shape_cast %83 : vector<1x16x128xf32> to vector<16x128xf32>
    %85 = arith.truncf %77 : vector<16x128xf32> to vector<16x128xbf16>
    %cst_45 = arith.constant dense<0.000000e+00> : vector<16x128xf32>
    %86 = tpu.matmul %85, %14, %cst_45 {dimension_numbers = #tpu.dot_dimension_numbers<[1], [0], [0], [1], [0, 0, 1, 1], [], []>} : vector<16x128xbf16>, vector<128x128xbf16>, vector<16x128xf32> -> vector<16x128xf32>
    %87 = arith.addf %84, %86 : vector<16x128xf32>
    %88 = math.tanh %87 : vector<16x128xf32>
    %89 = arith.index_cast %c6_i32 : i32 to index
    %c0_46 = arith.constant 0 : index
    %c0_47 = arith.constant 0 : index
    %90 = vector.load %arg7[%89, %c0_46, %c0_47] : memref<8x16x128xf32, #tpu.memory_space<vmem>>, vector<1x16x128xf32>
    %91 = vector.shape_cast %90 : vector<1x16x128xf32> to vector<16x128xf32>
    %92 = vector.shape_cast %88 : vector<16x128xf32> to vector<1x16x128xf32>
    tpu.vector_store %arg7[%89, %c0_46, %c0_47], %92 {strides = array<i32>} : memref<8x16x128xf32, #tpu.memory_space<vmem>>, vector<1x16x128xf32>,
    %c7_i32 = arith.constant 7 : i32
    %93 = arith.index_cast %c7_i32 : i32 to index
    %c0_48 = arith.constant 0 : index
    %c0_49 = arith.constant 0 : index
    %94 = vector.load %arg10[%93, %c0_48, %c0_49] : memref<8x16x128xf32, #tpu.memory_space<vmem>>, vector<1x16x128xf32>
    %95 = vector.shape_cast %94 : vector<1x16x128xf32> to vector<16x128xf32>
    %96 = arith.truncf %88 : vector<16x128xf32> to vector<16x128xbf16>
    %cst_50 = arith.constant dense<0.000000e+00> : vector<16x128xf32>
    %97 = tpu.matmul %96, %14, %cst_50 {dimension_numbers = #tpu.dot_dimension_numbers<[1], [0], [0], [1], [0, 0, 1, 1], [], []>} : vector<16x128xbf16>, vector<128x128xbf16>, vector<16x128xf32> -> vector<16x128xf32>
    %98 = arith.addf %95, %97 : vector<16x128xf32>
    %99 = math.tanh %98 : vector<16x128xf32>
    %100 = arith.index_cast %c7_i32 : i32 to index
    %c0_51 = arith.constant 0 : index
    %c0_52 = arith.constant 0 : index
    %101 = vector.load %arg7[%100, %c0_51, %c0_52] : memref<8x16x128xf32, #tpu.memory_space<vmem>>, vector<1x16x128xf32>
    %102 = vector.shape_cast %101 : vector<1x16x128xf32> to vector<16x128xf32>
    %103 = vector.shape_cast %99 : vector<16x128xf32> to vector<1x16x128xf32>
    tpu.vector_store %arg7[%100, %c0_51, %c0_52], %103 {strides = array<i32>} : memref<8x16x128xf32, #tpu.memory_space<vmem>>, vector<1x16x128xf32>,
    %c8_i32 = arith.constant 8 : i32
    %c0_53 = arith.constant 0 : index
    %c0_54 = arith.constant 0 : index
    %104 = vector.load %arg9[%c0_53, %c0_54] : memref<16x128xf32, #tpu.memory_space<vmem>>, vector<16x128xf32>
    tpu.vector_store %arg9[%c0_53, %c0_54], %99 {strides = array<i32>} : memref<16x128xf32, #tpu.memory_space<vmem>>, vector<16x128xf32>,
    %105 = arith.truncf %99 : vector<16x128xf32> to vector<16x128xbf16>
    %c0_55 = arith.constant 0 : index
    %c0_56 = arith.constant 0 : index
    %106 = vector.load %arg5[%c0_55, %c0_56] : memref<128x128xbf16, #tpu.memory_space<vmem>>, vector<128x128xbf16>
    %cst_57 = arith.constant dense<0.000000e+00> : vector<16x128xf32>
    %107 = tpu.matmul %105, %106, %cst_57 {dimension_numbers = #tpu.dot_dimension_numbers<[1], [0], [0], [1], [0, 0, 1, 1], [], []>} : vector<16x128xbf16>, vector<128x128xbf16>, vector<16x128xf32> -> vector<16x128xf32>
    %c0_58 = arith.constant 0 : index
    %c0_59 = arith.constant 0 : index
    %108 = vector.load %arg6[%c0_58, %c0_59] : memref<1x128xf32, #tpu.memory_space<vmem>>, vector<1x128xf32>
    %109 = vector.broadcast %108 : vector<1x128xf32> to vector<16x128xf32>
    %110 = arith.addf %107, %109 : vector<16x128xf32>
    %c0_60 = arith.constant 0 : index
    %c0_61 = arith.constant 0 : index
    %111 = vector.load %arg8[%c0_60, %c0_61] : memref<16x128xf32, #tpu.memory_space<vmem>>, vector<16x128xf32>
    tpu.vector_store %arg8[%c0_60, %c0_61], %110 {strides = array<i32>} : memref<16x128xf32, #tpu.memory_space<vmem>>, vector<16x128xf32>,
    return
  }
  func.func @transform_0(%arg0: i32) -> (i32, i32, i32) {
    %c0_i32 = arith.constant 0 : i32
    %c0_i32_0 = arith.constant 0 : i32
    %c0_i32_1 = arith.constant 0 : i32
    return %arg0, %c0_i32, %c0_i32_0 : i32, i32, i32
  }
  func.func @transform_1(%arg0: i32) -> (i32, i32) {
    %c0_i32 = arith.constant 0 : i32
    %c0_i32_0 = arith.constant 0 : i32
    %c0_i32_1 = arith.constant 0 : i32
    return %c0_i32, %c0_i32_0 : i32, i32
  }
  func.func @transform_2(%arg0: i32) -> (i32, i32) {
    %c0_i32 = arith.constant 0 : i32
    %c0_i32_0 = arith.constant 0 : i32
    %c0_i32_1 = arith.constant 0 : i32
    return %c0_i32, %c0_i32_0 : i32, i32
  }
  func.func @transform_3(%arg0: i32) -> (i32, i32) {
    %c0_i32 = arith.constant 0 : i32
    %c0_i32_0 = arith.constant 0 : i32
    %c0_i32_1 = arith.constant 0 : i32
    return %c0_i32, %c0_i32_0 : i32, i32
  }
  func.func @transform_4(%arg0: i32) -> (i32, i32) {
    %c0_i32 = arith.constant 0 : i32
    %c0_i32_0 = arith.constant 0 : i32
    %c0_i32_1 = arith.constant 0 : i32
    return %c0_i32, %c0_i32_0 : i32, i32
  }
  func.func @transform_5(%arg0: i32) -> (i32, i32) {
    %c0_i32 = arith.constant 0 : i32
    %c0_i32_0 = arith.constant 0 : i32
    %c0_i32_1 = arith.constant 0 : i32
    return %c0_i32, %c0_i32_0 : i32, i32
  }
  func.func @transform_6(%arg0: i32) -> (i32, i32, i32) {
    %c0_i32 = arith.constant 0 : i32
    %c0_i32_0 = arith.constant 0 : i32
    %c0_i32_1 = arith.constant 0 : i32
    return %arg0, %c0_i32, %c0_i32_0 : i32, i32, i32
  }
  func.func @transform_7(%arg0: i32) -> (i32, i32) {
    %c0_i32 = arith.constant 0 : i32
    %c0_i32_0 = arith.constant 0 : i32
    %c0_i32_1 = arith.constant 0 : i32
    return %c0_i32, %c0_i32_0 : i32, i32
  }
}

</mosaic_0001>

<bundles_post_ra>
// kernel: rnn_forward_and_decode.1
= control target key start
LH: loop header
LB: loop body
LE: loop exit
PB: predicated region body
PF: predicated region fallthrough
CT: control target
= control target key end

     0   :  { %s1814_s24 = smov 0   ;;  %s2202_s0 = inlined_call_operand.vmem [shape: s32[4,128,1], index: 0, kind: input, shape index: {}]   ;;  %s2203_s1 = inlined_call_operand.vmem [shape: f32[128,128], index: 1, kind: input, shape index: {}]   ;;  %s2204_s2 = inlined_call_operand.vmem [shape: f32[16,128], index: 2, kind: input, shape index: {}]   ;;  %s2205_s3 = inlined_call_operand.vmem [shape: bf16[128,128], index: 3, kind: input, shape index: {}]   ;;  %s2206_s4 = inlined_call_operand.vmem [shape: bf16[128,128], index: 4, kind: input, shape index: {}]   ;;  %s2207_s5 = inlined_call_operand.vmem [shape: f32[1,128], index: 5, kind: input, shape index: {}]   ;;  %s2208_s6 = inlined_call_operand.vmem [shape: f32[32,16,128], index: 6, kind: output, shape index: {0}]   ;;  %s2209_s7 = inlined_call_operand.vmem [shape: f32[16,128], index: 7, kind: output, shape index: {1}]  }
   0x1 LB: > { %s1241_s25 = sadd.s32 4294967295, %s1768_s24   ;;  %p1245_p0 = scmp.ge.s32.totalorder %s1768_s24, 1  ;;  %s1768_s24 = sphi %s1814_s24, %s18_s24  }
   0x2   : > { %p235_p1 = scmp.lt.s32.totalorder %s1768_s24, 5 }
   0x4   : > { %p236_p2 = pnand %p1245_p0, %p235_p1 }
   0x5   : > { %p268_p3 = scmp.lt.s32.totalorder (!%p236_p2), %s1241_s25, 3  ;;  %s1248_s26 = sshll.u32 (!%p236_p2), %s1241_s25, 3 }
   0x6   : > { %239 = sbr.rel (%p236_p2) target bundleno = 2204 (0x89c), region = 44  ;;  %p274_p4 = scmp.lt.s32.totalorder (!%p236_p2), %s1248_s26, 31 }
   0x7   : > { %p1251_p5 = scmp.ne.s32.totalorder (!%p236_p2), %s1241_s25, 0 }
   0xd   : > { %s269_s27 = scalar_select %p268_p3, %s1241_s25, 3 }
   0xe   : > { %s2211_s26 = smov (!%p274_p4, %s1248_s26), 31  ;;  %284 = sbr.rel (%p1251_p5) target bundleno = 21 (0x15), region = 48 }
   0xf   : > { %s1317_s28 = sshll.u32 %s269_s27, 7  ;;  %s1318_s9 = sshll.u32 %s2211_s26, 4  ;;  %v285_v0 = vld [vmem:[%s2204_s2] sm:$0xff] (!%p1251_p5)  ;;  %v286_v1 = vld [vmem:[%s2204_s2 + $0x8] sm:$0xff] (!%p1251_p5) }
  0x10   : > { %s1825_s8 = scalar_lea.vmem %s2202_s0, %s1317_s28  ;;  %s1830_s12 = scalar_lea.vmem %s2208_s6, %s1318_s9  ;;  %287 = vst [vmem:[#allocation2] sm:$0xff] (!%p1251_p5), %v285_v0  ;;  %288 = vst [vmem:[#allocation2 + $0x8] sm:$0xff] (!%p1251_p5), %v286_v1 }
  0x15 PF: > { %v289_v2 = vld [vmem:[%s1825_s8] sm:$0xff]  ;;  %v291_v3 = vld [vmem:[%s1825_s8 + $0x10] sm:$0xff]  ;;  %v1770_v4 = vmov 0   ;;  %v290_v5 = vld [vmem:[%s1825_s8 + $0x8] sm:$0xff]  ;;  %v1771_v7 = vmov 0.0   ;;  %vm1772_vm0 = vmmov 0   ;;  %v305_v55 = vlaneseq }
  0x16   : > { %1712 = vset.pattern.permute.xlu0 %v1770_v4  ;;  %1713 = vset.pattern.permute.xlu1 %v1770_v4  ;;  %v292_v6 = vld [vmem:[%s1825_s8 + $0x18] sm:$0xff]  ;;  %v293_v8 = vld [vmem:[%s1825_s8 + $0x20] sm:$0xff]  ;;  %v294_v9 = vld [vmem:[%s1825_s8 + $0x28] sm:$0xff]  ;;  %v1773_v59 = vmov 1.0  }
  0x17   : > { %308 = vperm.xlu0 %1712, %v289_v2   ;;  %314 = vperm.xlu1 %1713, %v291_v3   ;;  %v1850_v10 = vld [vmem:[%s2205_s3] sm:$0xff]   ;;  %v404_v12 = vld [vmem:[%s2203_s1 + $0x8] sm:$0xff]  ;;  %v405_v15 = vld [vmem:[%s2203_s1 + $0x10] sm:$0xff]  ;;  %v1980_v56 = vand.u32 127, %v305_v55 }
  0x18   : > { %1488 = vmatprep.subr.bf16.mxu1 %v1771_v7  ;;  %1504 = vmatprep.mubr.msk.bf16.mxu1 %vm1772_vm0, %v1771_v7  ;;  %v403_v11 = vld [vmem:[%s2203_s1] sm:$0xff]  ;;  %v1862_v14 = vld [vmem:[%s2205_s3 + $0x8] sm:$0xff]   ;;  %v406_v16 = vld [vmem:[%s2203_s1 + $0x18] sm:$0xff] }
  0x19   : > { %1489 = vmatpush3.bf16.msra.mxu1 %v1850_v10  ;;  %v1668_v13 = vpack.c.bf16 %v404_v12, %v403_v11  ;;  %v1672_v17 = vpack.c.bf16 %v406_v16, %v405_v15  ;;  %v407_v18 = vld [vmem:[%s2203_s1 + $0x20] sm:$0xff]  ;;  %v408_v19 = vld [vmem:[%s2203_s1 + $0x28] sm:$0xff]  ;;  %v295_v20 = vld [vmem:[%s1825_s8 + $0x30] sm:$0xff] }
  0x1a   : > { %1490 = vmatprep.subr.bf16.mxu1 %v1771_v7  ;;  %v296_v21 = vld [vmem:[%s1825_s8 + $0x38] sm:$0xff]  ;;  %v1883_v22 = vld [vmem:[%s2205_s3 + $0x10] sm:$0xff]   ;;  %v1676_v23 = vpack.c.bf16 %v408_v19, %v407_v18  ;;  %v297_v26 = vld [vmem:[%s1825_s8 + $0x40] sm:$0xff] }
  0x1b   : > { %311 = vperm.xlu0 %1712, %v290_v5   ;;  %317 = vperm.xlu1 %1713, %v292_v6   ;;  %v409_v24 = vld [vmem:[%s2203_s1 + $0x30] sm:$0xff]  ;;  %v410_v25 = vld [vmem:[%s2203_s1 + $0x38] sm:$0xff]  ;;  %v298_v27 = vld [vmem:[%s1825_s8 + $0x48] sm:$0xff] }
  0x1c   : > { %1669 = vmatprep.subr.bf16.mxu0 %v1668_v13  ;;  %v1898_v28 = vld [vmem:[%s2205_s3 + $0x18] sm:$0xff]   ;;  %v1680_v29 = vpack.c.bf16 %v410_v25, %v409_v24  ;;  %v411_v30 = vld [vmem:[%s2203_s1 + $0x40] sm:$0xff]  ;;  %v412_v31 = vld [vmem:[%s2203_s1 + $0x48] sm:$0xff] }
  0x1d   : > { %1671 = vmatpush3.bf16.msra.mxu0 %v1668_v13  ;;  %1491 = vmatpush3.bf16.msra.mxu1 %v1862_v14  ;;  %v299_v32 = vld [vmem:[%s1825_s8 + $0x50] sm:$0xff]  ;;  %v300_v33 = vld [vmem:[%s1825_s8 + $0x58] sm:$0xff]  ;;  %v1912_v34 = vld [vmem:[%s2205_s3 + $0x20] sm:$0xff]   ;;  %v1684_v37 = vpack.c.bf16 %v412_v31, %v411_v30 }
  0x1e   : > { %1673 = vmatprep.subr.bf16.mxu0 %v1672_v17  ;;  %1492 = vmatprep.subr.bf16.mxu1 %v1771_v7  ;;  %v413_v35 = vld [vmem:[%s2203_s1 + $0x50] sm:$0xff]  ;;  %v414_v36 = vld [vmem:[%s2203_s1 + $0x58] sm:$0xff]  ;;  %v301_v38 = vld [vmem:[%s1825_s8 + $0x60] sm:$0xff] }
  0x1f   : > { %320 = vperm.xlu0 %1712, %v293_v8   ;;  %323 = vperm.xlu1 %1713, %v294_v9   ;;  %v302_v39 = vld [vmem:[%s1825_s8 + $0x68] sm:$0xff]  ;;  %v1688_v41 = vpack.c.bf16 %v414_v36, %v413_v35  ;;  %v415_v42 = vld [vmem:[%s2203_s1 + $0x60] sm:$0xff]  ;;  %v303_v44 = vld [vmem:[%s1825_s8 + $0x70] sm:$0xff] }
  0x20   : > { %v1927_v40 = vld [vmem:[%s2205_s3 + $0x28] sm:$0xff]   ;;  %v1942_v45 = vld [vmem:[%s2205_s3 + $0x30] sm:$0xff]   ;;  %v418_v48 = vld [vmem:[%s2203_s1 + $0x78] sm:$0xff] }
  0x21   : > { %1675 = vmatpush3.bf16.msra.mxu0 %v1672_v17  ;;  %1493 = vmatpush3.bf16.msra.mxu1 %v1883_v22  ;;  %v416_v43 = vld [vmem:[%s2203_s1 + $0x68] sm:$0xff]  ;;  %v417_v47 = vld [vmem:[%s2203_s1 + $0x70] sm:$0xff]  ;;  %v1955_v49 = vld [vmem:[%s2205_s3 + $0x38] sm:$0xff]  }
  0x22   : > { %1677 = vmatprep.subr.bf16.mxu0 %v1676_v23  ;;  %1494 = vmatprep.subr.bf16.mxu1 %v1771_v7  ;;  %v1692_v46 = vpack.c.bf16 %v416_v43, %v415_v42  ;;  %v596_v50 = vld [vmem:[#allocation2] sm:$0xff]  ;;  %v597_v51 = vld [vmem:[#allocation2 + $0x8] sm:$0xff]  ;;  %v1696_v52 = vpack.c.bf16 %v418_v48, %v417_v47  ;;  %v304_v53 = vld [vmem:[%s1825_s8 + $0x78] sm:$0xff] }
  0x23   : > { %326 = vperm.xlu0 %1712, %v295_v20   ;;  %329 = vperm.xlu1 %1713, %v296_v21   ;;  %v600_v54 = vpack.c.bf16 %v597_v51, %v596_v50 }
  0x25   : > { %1679 = vmatpush3.bf16.msra.mxu0 %v1676_v23  ;;  %1495 = vmatpush3.bf16.msra.mxu1 %v1898_v28 }
  0x26   : > { %1681 = vmatprep.subr.bf16.mxu0 %v1680_v29  ;;  %1496 = vmatprep.subr.bf16.mxu1 %v1771_v7 }
  0x27   : > { %332 = vperm.xlu0 %1712, %v297_v26   ;;  %335 = vperm.xlu1 %1713, %v298_v27  }
  0x29   : > { %1683 = vmatpush3.bf16.msra.mxu0 %v1680_v29  ;;  %1497 = vmatpush3.bf16.msra.mxu1 %v1912_v34 }
  0x2a   : > { %1685 = vmatprep.subr.bf16.mxu0 %v1684_v37  ;;  %1498 = vmatprep.subr.bf16.mxu1 %v1771_v7 }
  0x2b   : > { %338 = vperm.xlu0 %1712, %v299_v32   ;;  %341 = vperm.xlu1 %1713, %v300_v33  }
  0x2d   : > { %1687 = vmatpush3.bf16.msra.mxu0 %v1684_v37  ;;  %1499 = vmatpush3.bf16.msra.mxu1 %v1927_v40 }
  0x2e   : > { %1689 = vmatprep.subr.bf16.mxu0 %v1688_v41  ;;  %1500 = vmatprep.subr.bf16.mxu1 %v1771_v7 }
  0x2f   : > { %344 = vperm.xlu0 %1712, %v301_v38   ;;  %347 = vperm.xlu1 %1713, %v302_v39  }
  0x31   : > { %1691 = vmatpush3.bf16.msra.mxu0 %v1688_v41  ;;  %1501 = vmatpush3.bf16.msra.mxu1 %v1942_v45 }
  0x32   : > { %1693 = vmatprep.subr.bf16.mxu0 %v1692_v46  ;;  %1502 = vmatprep.subr.bf16.mxu1 %v1771_v7 }
  0x33   : > { %350 = vperm.xlu0 %1712, %v303_v44   ;;  %353 = vperm.xlu1 %1713, %v304_v53  }
  0x35   : > { %1695 = vmatpush3.bf16.msra.mxu0 %v1692_v46  ;;  %1503 = vmatpush3.bf16.msra.mxu1 %v1955_v49 }
  0x36   : > { %1697 = vmatprep.subr.bf16.mxu0 %v1696_v52  ;;  %1528 = vmatprep.subr.bf16.mxu1 %v1771_v7 }
  0x38   : > { %1505 = vmatmul.mubr.bf16.vlgmr.msra.gmra.mrb[0].mxu1 %v600_v54 }
  0x39   : > { %1699 = vmatpush3.bf16.msra.mxu0 %v1696_v52  ;;  %1529 = vmatpush3.bf16.msra.mxu1 %v1850_v10 }
  0x3a   : > { %1508 = vmatprep.subr.bf16.mxu0 %v1771_v7  ;;  %1530 = vmatprep.subr.bf16.mxu1 %v1771_v7 }
  0x3b   : > { %1544 = vmatprep.mubr.msk.bf16.mxu1 %vm1772_vm0, %v1771_v7 }
  0x3d   : > { %1531 = vmatpush3.bf16.msra.mxu1 %v1862_v14 }
  0x3e   : > { %1532 = vmatprep.subr.bf16.mxu1 %v1771_v7 }
  0x41   : > { %1533 = vmatpush3.bf16.msra.mxu1 %v1883_v22 }
  0x42   : > { %1534 = vmatprep.subr.bf16.mxu1 %v1771_v7 }
  0x45   : > { %1535 = vmatpush3.bf16.msra.mxu1 %v1898_v28 }
  0x46   : > { %1536 = vmatprep.subr.bf16.mxu1 %v1771_v7 }
  0x49   : > { %1537 = vmatpush3.bf16.msra.mxu1 %v1912_v34 }
  0x4a   : > { %1538 = vmatprep.subr.bf16.mxu1 %v1771_v7 }
  0x4d   : > { %1539 = vmatpush3.bf16.msra.mxu1 %v1927_v40 }
  0x4e   : > { %1540 = vmatprep.subr.bf16.mxu1 %v1771_v7 }
  0x51   : > { %1541 = vmatpush3.bf16.msra.mxu1 %v1942_v45 }
  0x52   : > { %1542 = vmatprep.subr.bf16.mxu1 %v1771_v7 }
  0x55   : > { %1543 = vmatpush3.bf16.msra.mxu1 %v1955_v49 }
  0x56   : > { %1568 = vmatprep.subr.bf16.mxu1 %v1771_v7 }
  0x96   : > { %v309_v57 = vpop.permute.xlu0 %308  ;;  %v315_v58 = vpop.permute.xlu1 %314 }
  0x97   : > { %vm355_vm1 = vcmp.eq.s32.totalorder %v1980_v56, %v309_v57  ;;  %vm357_vm2 = vcmp.eq.s32.totalorder %v1980_v56, %v315_v58 }
  0x98   : > { %1464 = vmatprep.mubr.msk.f32.mxu0 %vm355_vm1, %v1773_v59 }
  0x9a   : > { %v312_v60 = vpop.permute.xlu0 %311  ;;  %v318_v61 = vpop.permute.xlu1 %317 }
  0x9b   : > { %vm356_vm3 = vcmp.eq.s32.totalorder %v1980_v56, %v312_v60  ;;  %vm358_vm4 = vcmp.eq.s32.totalorder %v1980_v56, %v318_v61 }
  0x9c   : > { %1465 = vmatmul.mubr.msk.f32.vlgmr.msra.gmra.mrb[0].mxu0 %vm356_vm3, %v1773_v59 }
  0x9d   : > { %1467 = vmatprep.mubr.msk.f32.mxu0 %vm357_vm2, %v1773_v59  ;;  %1509 = vmatpush3.bf16.msra.mxu0 %v1850_v10 }
  0x9e   : > { %v321_v62 = vpop.permute.xlu0 %320  ;;  %v324_v63 = vpop.permute.xlu1 %323  ;;  %1510 = vmatprep.subr.bf16.mxu0 %v1771_v7 }
  0x9f   : > { %vm359_vm5 = vcmp.eq.s32.totalorder %v1980_v56, %v321_v62  ;;  %vm360_vm6 = vcmp.eq.s32.totalorder %v1980_v56, %v324_v63 }
  0xa0   : > { %1468 = vmatmul.mubr.msk.f32.gmra.mrb[2].mxu0 %vm358_vm4, %v1773_v59 }
  0xa1   : > { %1470 = vmatprep.mubr.msk.f32.mxu0 %vm359_vm5, %v1773_v59  ;;  %1511 = vmatpush3.bf16.msra.mxu0 %v1862_v14 }
  0xa2   : > { %v327_v0 = vpop.permute.xlu0 %326  ;;  %v330_v1 = vpop.permute.xlu1 %329  ;;  %1512 = vmatprep.subr.bf16.mxu0 %v1771_v7 }
  0xa3   : > { %vm361_vm7 = vcmp.eq.s32.totalorder %v1980_v56, %v327_v0  ;;  %vm362_vm8 = vcmp.eq.s32.totalorder %v1980_v56, %v330_v1 }
  0xa4   : > { %1471 = vmatmul.mubr.msk.f32.gmra.mrb[4].mxu0 %vm360_vm6, %v1773_v59 }
  0xa5   : > { %1473 = vmatprep.mubr.msk.f32.mxu0 %vm361_vm7, %v1773_v59  ;;  %1513 = vmatpush3.bf16.msra.mxu0 %v1883_v22 }
  0xa6   : > { %v333_v2 = vpop.permute.xlu0 %332  ;;  %v336_v3 = vpop.permute.xlu1 %335  ;;  %1514 = vmatprep.subr.bf16.mxu0 %v1771_v7 }
  0xa7   : > { %vm363_vm9 = vcmp.eq.s32.totalorder %v1980_v56, %v333_v2  ;;  %vm364_vm10 = vcmp.eq.s32.totalorder %v1980_v56, %v336_v3 }
  0xa8   : > { %1474 = vmatmul.mubr.msk.f32.gmra.mrb[6].mxu0 %vm362_vm8, %v1773_v59 }
  0xa9   : > { %1476 = vmatprep.mubr.msk.f32.mxu0 %vm363_vm9, %v1773_v59  ;;  %1515 = vmatpush3.bf16.msra.mxu0 %v1898_v28 }
  0xaa   : > { %v339_v4 = vpop.permute.xlu0 %338  ;;  %v342_v5 = vpop.permute.xlu1 %341  ;;  %1516 = vmatprep.subr.bf16.mxu0 %v1771_v7 }
  0xab   : > { %vm365_vm11 = vcmp.eq.s32.totalorder %v1980_v56, %v339_v4  ;;  %vm366_vm12 = vcmp.eq.s32.totalorder %v1980_v56, %v342_v5 }
  0xac   : > { %1477 = vmatmul.mubr.msk.f32.gmra.mrb[8].mxu0 %vm364_vm10, %v1773_v59 }
  0xad   : > { %1479 = vmatprep.mubr.msk.f32.mxu0 %vm365_vm11, %v1773_v59  ;;  %1517 = vmatpush3.bf16.msra.mxu0 %v1912_v34 }
  0xae   : > { %v345_v6 = vpop.permute.xlu0 %344  ;;  %v348_v8 = vpop.permute.xlu1 %347  ;;  %1518 = vmatprep.subr.bf16.mxu0 %v1771_v7 }
  0xaf   : > { %vm367_vm13 = vcmp.eq.s32.totalorder %v1980_v56, %v345_v6  ;;  %vm368_vm14 = vcmp.eq.s32.totalorder %v1980_v56, %v348_v8 }
  0xb0   : > { %1480 = vmatmul.mubr.msk.f32.gmra.mrb[10].mxu0 %vm366_vm12, %v1773_v59 }
  0xb1   : > { %1482 = vmatprep.mubr.msk.f32.mxu0 %vm367_vm13, %v1773_v59  ;;  %1519 = vmatpush3.bf16.msra.mxu0 %v1927_v40 }
  0xb2   : > { %v351_v9 = vpop.permute.xlu0 %350  ;;  %1520 = vmatprep.subr.bf16.mxu0 %v1771_v7  ;;  %v354_v11 = vpop.permute.xlu1 %353 }
  0xb3   : > { %vm369_vm15 = vcmp.eq.s32.totalorder %v1980_v56, %v351_v9  ;;  %vm370_vm1 = vcmp.eq.s32.totalorder %v1980_v56, %v354_v11 }
  0xb4   : > { %1483 = vmatmul.mubr.msk.f32.gmra.mrb[12].mxu0 %vm368_vm14, %v1773_v59 }
  0xb5   : > { %1485 = vmatprep.mubr.msk.f32.mxu0 %vm369_vm15, %v1773_v59  ;;  %1521 = vmatpush3.bf16.msra.mxu0 %v1942_v45 }
  0xb6   : > { %1522 = vmatprep.subr.bf16.mxu0 %v1771_v7 }
  0xb8   : > { %1486 = vmatmul.mubr.msk.f32.gmra.mrb[14].mxu0 %vm370_vm1, %v1773_v59 }
  0xb9   : > { %1523 = vmatpush3.bf16.msra.mxu0 %v1955_v49  ;;  %1524 = vmatprep.mubr.msk.bf16.mxu0 %vm1772_vm0, %v1771_v7 }
  0xba   : > { %1548 = vmatprep.subr.bf16.mxu0 %v1771_v7 }
 0x10b   : > { %v683_v12 = vpop.f32.mrb[0].mxu1 }
 0x10c   : > { %v1506_v13 = vpop.f32.mrb[1].mxu1 }
 0x10d   : > { %v686_v15 = vpop.f32.mrb[2].mxu1 }
 0x10e   : > { %v1507_v16 = vpop.f32.mrb[3].mxu1 }
 0x16f   : > { %v1466_v17 = vpop.f32.mrb[0].mxu0 }
 0x170   : > { %v691_v18 = vadd.f32 %v1466_v17, %v686_v15  ;;  %v485_v19 = vpop.f32.mrb[1].mxu0 }
 0x171   : > { %v690_v20 = vadd.f32 %v683_v12, %v485_v19 }
 0x172   : > { %1730 = vtanh.f32 %v691_v18 }
 0x173   : > { %1732 = vtanh.f32 %v690_v20  ;;  %v1469_v21 = vpop.f32.mrb[2].mxu0 }
 0x174   : > { %v495_v23 = vpop.f32.mrb[3].mxu0 }
 0x177   : > { %v2016_v24 = vpop.f32.mrb[4].mxu0 }
 0x178   : > { %v2018_v25 = vpop.f32.mrb[5].mxu0 }
 0x17b   : > { %v2020_v26 = vpop.f32.mrb[6].mxu0 }
 0x17c   : > { %v1731_v27 = vpop.eup %1730  ;;  %v2022_v29 = vpop.f32.mrb[7].mxu0 }
 0x17d   : > { %v1733_v30 = vpop.eup %1732  ;;  %695 = vst [vmem:[%s1830_s12 + $0x8] sm:$0xff] %v1731_v27 }
 0x17e   : > { %694 = vst [vmem:[%s1830_s12] sm:$0xff] %v1733_v30  ;;  %v699_v31 = vpack.c.bf16 %v1731_v27, %v1733_v30 }
 0x17f   : > { %v2026_v32 = vpop.f32.mrb[8].mxu0 }
 0x180   : > { %1525 = vmatmul.mubr.bf16.vlgmr.msra.gmra.mrb[16].mxu0 %v699_v31  ;;  %v2028_v33 = vpop.f32.mrb[9].mxu0 }
 0x181   : > { %1549 = vmatpush3.bf16.msra.mxu0 %v1850_v10  ;;  %1564 = vmatprep.mubr.msk.bf16.mxu0 %vm1772_vm0, %v1771_v7 }
 0x182   : > { %1550 = vmatprep.subr.bf16.mxu0 %v1771_v7 }
 0x183   : > { %v2034_v35 = vpop.f32.mrb[10].mxu0 }
 0x184   : > { %v2036_v36 = vpop.f32.mrb[11].mxu0 }
 0x185   : > { %1551 = vmatpush3.bf16.msra.mxu0 %v1862_v14 }
 0x186   : > { %1552 = vmatprep.subr.bf16.mxu0 %v1771_v7 }
 0x187   : > { %v2040_v37 = vpop.f32.mrb[12].mxu0 }
 0x188   : > { %v2042_v38 = vpop.f32.mrb[13].mxu0 }
 0x189   : > { %1553 = vmatpush3.bf16.msra.mxu0 %v1883_v22 }
 0x18a   : > { %1554 = vmatprep.subr.bf16.mxu0 %v1771_v7 }
 0x18b   : > { %v2046_v39 = vpop.f32.mrb[14].mxu0 }
 0x18c   : > { %v2048_v41 = vpop.f32.mrb[15].mxu0 }
 0x18d   : > { %1555 = vmatpush3.bf16.msra.mxu0 %v1898_v28 }
 0x18e   : > { %1556 = vmatprep.subr.bf16.mxu0 %v1771_v7 }
 0x191   : > { %1557 = vmatpush3.bf16.msra.mxu0 %v1912_v34 }
 0x192   : > { %1558 = vmatprep.subr.bf16.mxu0 %v1771_v7 }
 0x195   : > { %1559 = vmatpush3.bf16.msra.mxu0 %v1927_v40 }
 0x196   : > { %1560 = vmatprep.subr.bf16.mxu0 %v1771_v7 }
 0x199   : > { %1561 = vmatpush3.bf16.msra.mxu0 %v1942_v45 }
 0x19a   : > { %1562 = vmatprep.subr.bf16.mxu0 %v1771_v7 }
 0x19d   : > { %1563 = vmatpush3.bf16.msra.mxu0 %v1955_v49 }
 0x19e   : > { %1588 = vmatprep.subr.bf16.mxu0 %v1771_v7 }
 0x253   : > { %v734_v42 = vpop.f32.mrb[16].mxu0 }
 0x254   : > { %v741_v43 = vadd.f32 %v734_v42, %v495_v23  ;;  %v1526_v44 = vpop.f32.mrb[17].mxu0  ;;  %v1724_v23 = vld [vmem:[%s2206_s4 + $0x10] sm:$0xff]   ;;  %v1729_v42 = vld [vmem:[%s2206_s4 + $0x38] sm:$0xff]  }
 0x255   : > { %v737_v46 = vpop.f32.mrb[18].mxu0 }
 0x256   : > { %1734 = vtanh.f32 %v741_v43  ;;  %v742_v47 = vadd.f32 %v1469_v21, %v737_v46  ;;  %v1527_v48 = vpop.f32.mrb[19].mxu0 }
 0x258   : > { %1736 = vtanh.f32 %v742_v47 }
 0x260   : > { %v1735_v50 = vpop.eup %1734 }
 0x261   : > { %1292 = vst [vmem:[%s1830_s12 + $0x10] sm:$0xff] %v1735_v50 }
 0x262   : > { %v1737_v51 = vpop.eup %1736 }
 0x263   : > { %1293 = vst [vmem:[%s1830_s12 + $0x18] sm:$0xff] %v1737_v51  ;;  %v751_v52 = vpack.c.bf16 %v1737_v51, %v1735_v50 }
 0x265   : > { %1545 = vmatmul.mubr.bf16.vlgmr.msra.gmra.mrb[4].mxu1 %v751_v52 }
 0x266   : > { %1569 = vmatpush3.bf16.msra.mxu1 %v1850_v10  ;;  %1584 = vmatprep.mubr.msk.bf16.mxu1 %vm1772_vm0, %v1771_v7 }
 0x267   : > { %1570 = vmatprep.subr.bf16.mxu1 %v1771_v7 }
 0x26a   : > { %1571 = vmatpush3.bf16.msra.mxu1 %v1862_v14 }
 0x26b   : > { %1572 = vmatprep.subr.bf16.mxu1 %v1771_v7 }
 0x26e   : > { %1573 = vmatpush3.bf16.msra.mxu1 %v1883_v22 }
 0x26f   : > { %1574 = vmatprep.subr.bf16.mxu1 %v1771_v7 }
 0x272   : > { %1575 = vmatpush3.bf16.msra.mxu1 %v1898_v28 }
 0x273   : > { %1576 = vmatprep.subr.bf16.mxu1 %v1771_v7 }
 0x276   : > { %1577 = vmatpush3.bf16.msra.mxu1 %v1912_v34 }
 0x277   : > { %1578 = vmatprep.subr.bf16.mxu1 %v1771_v7 }
 0x27a   : > { %1579 = vmatpush3.bf16.msra.mxu1 %v1927_v40 }
 0x27b   : > { %1580 = vmatprep.subr.bf16.mxu1 %v1771_v7 }
 0x27e   : > { %1581 = vmatpush3.bf16.msra.mxu1 %v1942_v45 }
 0x27f   : > { %1582 = vmatprep.subr.bf16.mxu1 %v1771_v7 }
 0x282   : > { %1583 = vmatpush3.bf16.msra.mxu1 %v1955_v49 }
 0x283   : > { %1608 = vmatprep.subr.bf16.mxu1 %v1771_v7 }
 0x338   : > { %v786_v53 = vpop.f32.mrb[4].mxu1 }
 0x339   : > { %v793_v54 = vadd.f32 %v786_v53, %v2018_v25  ;;  %v1546_v55 = vpop.f32.mrb[5].mxu1  ;;  %v1306_v53 = vld [vmem:[%s2207_s5] ss:$0 sm:$0xff] }
 0x33a   : > { %v789_v56 = vpop.f32.mrb[6].mxu1 }
 0x33b   : > { %1738 = vtanh.f32 %v793_v54  ;;  %v794_v57 = vadd.f32 %v2016_v24, %v789_v56  ;;  %v1547_v58 = vpop.f32.mrb[7].mxu1  ;;  %v1725_v24 = vld [vmem:[%s2206_s4 + $0x18] sm:$0xff]  }
 0x33d   : > { %1740 = vtanh.f32 %v794_v57 }
 0x345   : > { %v1739_v59 = vpop.eup %1738 }
 0x346   : > { %1294 = vst [vmem:[%s1830_s12 + $0x20] sm:$0xff] %v1739_v59 }
 0x347   : > { %v1741_v60 = vpop.eup %1740 }
 0x348   : > { %1295 = vst [vmem:[%s1830_s12 + $0x28] sm:$0xff] %v1741_v60  ;;  %v803_v61 = vpack.c.bf16 %v1741_v60, %v1739_v59 }
 0x34a   : > { %1565 = vmatmul.mubr.bf16.vlgmr.msra.gmra.mrb[20].mxu0 %v803_v61 }
 0x34b   : > { %1589 = vmatpush3.bf16.msra.mxu0 %v1850_v10  ;;  %1604 = vmatprep.mubr.msk.bf16.mxu0 %vm1772_vm0, %v1771_v7 }
 0x34c   : > { %1590 = vmatprep.subr.bf16.mxu0 %v1771_v7 }
 0x34f   : > { %1591 = vmatpush3.bf16.msra.mxu0 %v1862_v14 }
 0x350   : > { %1592 = vmatprep.subr.bf16.mxu0 %v1771_v7 }
 0x353   : > { %1593 = vmatpush3.bf16.msra.mxu0 %v1883_v22 }
 0x354   : > { %1594 = vmatprep.subr.bf16.mxu0 %v1771_v7 }
 0x357   : > { %1595 = vmatpush3.bf16.msra.mxu0 %v1898_v28 }
 0x358   : > { %1596 = vmatprep.subr.bf16.mxu0 %v1771_v7 }
 0x35b   : > { %1597 = vmatpush3.bf16.msra.mxu0 %v1912_v34 }
 0x35c   : > { %1598 = vmatprep.subr.bf16.mxu0 %v1771_v7 }
 0x35f   : > { %1599 = vmatpush3.bf16.msra.mxu0 %v1927_v40 }
 0x360   : > { %1600 = vmatprep.subr.bf16.mxu0 %v1771_v7 }
 0x363   : > { %1601 = vmatpush3.bf16.msra.mxu0 %v1942_v45 }
 0x364   : > { %1602 = vmatprep.subr.bf16.mxu0 %v1771_v7 }
 0x367   : > { %1603 = vmatpush3.bf16.msra.mxu0 %v1955_v49 }
 0x368   : > { %1628 = vmatprep.subr.bf16.mxu0 %v1771_v7 }
 0x41d   : > { %v838_v62 = vpop.f32.mrb[20].mxu0 }
 0x41e   : > { %v845_v63 = vadd.f32 %v838_v62, %v2022_v29  ;;  %v1566_v0 = vpop.f32.mrb[21].mxu0 }
 0x41f   : > { %v841_v1 = vpop.f32.mrb[22].mxu0 }
 0x420   : > { %1742 = vtanh.f32 %v845_v63  ;;  %v846_v2 = vadd.f32 %v2020_v26, %v841_v1  ;;  %v1567_v3 = vpop.f32.mrb[23].mxu0 }
 0x422   : > { %1744 = vtanh.f32 %v846_v2 }
 0x42a   : > { %v1743_v4 = vpop.eup %1742 }
 0x42b   : > { %1296 = vst [vmem:[%s1830_s12 + $0x30] sm:$0xff] %v1743_v4 }
 0x42c   : > { %v1745_v5 = vpop.eup %1744 }
 0x42d   : > { %1297 = vst [vmem:[%s1830_s12 + $0x38] sm:$0xff] %v1745_v5  ;;  %v855_v6 = vpack.c.bf16 %v1745_v5, %v1743_v4 }
 0x42f   : > { %1585 = vmatmul.mubr.bf16.vlgmr.msra.gmra.mrb[8].mxu1 %v855_v6 }
 0x430   : > { %1609 = vmatpush3.bf16.msra.mxu1 %v1850_v10  ;;  %1624 = vmatprep.mubr.msk.bf16.mxu1 %vm1772_vm0, %v1771_v7 }
 0x431   : > { %1610 = vmatprep.subr.bf16.mxu1 %v1771_v7 }
 0x434   : > { %1611 = vmatpush3.bf16.msra.mxu1 %v1862_v14 }
 0x435   : > { %1612 = vmatprep.subr.bf16.mxu1 %v1771_v7 }
 0x438   : > { %1613 = vmatpush3.bf16.msra.mxu1 %v1883_v22 }
 0x439   : > { %1614 = vmatprep.subr.bf16.mxu1 %v1771_v7 }
 0x43c   : > { %1615 = vmatpush3.bf16.msra.mxu1 %v1898_v28 }
 0x43d   : > { %1616 = vmatprep.subr.bf16.mxu1 %v1771_v7 }
 0x440   : > { %1617 = vmatpush3.bf16.msra.mxu1 %v1912_v34 }
 0x441   : > { %1618 = vmatprep.subr.bf16.mxu1 %v1771_v7 }
 0x444   : > { %1619 = vmatpush3.bf16.msra.mxu1 %v1927_v40 }
 0x445   : > { %1620 = vmatprep.subr.bf16.mxu1 %v1771_v7 }
 0x448   : > { %1621 = vmatpush3.bf16.msra.mxu1 %v1942_v45 }
 0x449   : > { %1622 = vmatprep.subr.bf16.mxu1 %v1771_v7 }
 0x44c   : > { %1623 = vmatpush3.bf16.msra.mxu1 %v1955_v49 }
 0x44d   : > { %1648 = vmatprep.subr.bf16.mxu1 %v1771_v7 }
 0x502   : > { %v890_v8 = vpop.f32.mrb[8].mxu1 }
 0x503   : > { %v897_v9 = vadd.f32 %v890_v8, %v2028_v33  ;;  %v1586_v11 = vpop.f32.mrb[9].mxu1 }
 0x504   : > { %v893_v12 = vpop.f32.mrb[10].mxu1 }
 0x505   : > { %1746 = vtanh.f32 %v897_v9  ;;  %v898_v13 = vadd.f32 %v2026_v32, %v893_v12  ;;  %v1587_v15 = vpop.f32.mrb[11].mxu1 }
 0x507   : > { %1748 = vtanh.f32 %v898_v13 }
 0x50f   : > { %v1747_v16 = vpop.eup %1746 }
 0x510   : > { %1298 = vst [vmem:[%s1830_s12 + $0x40] sm:$0xff] %v1747_v16 }
 0x511   : > { %v1749_v17 = vpop.eup %1748 }
 0x512   : > { %1299 = vst [vmem:[%s1830_s12 + $0x48] sm:$0xff] %v1749_v17  ;;  %v907_v18 = vpack.c.bf16 %v1749_v17, %v1747_v16 }
 0x514   : > { %1605 = vmatmul.mubr.bf16.vlgmr.msra.gmra.mrb[24].mxu0 %v907_v18 }
 0x515   : > { %1629 = vmatpush3.bf16.msra.mxu0 %v1850_v10  ;;  %1644 = vmatprep.mubr.msk.bf16.mxu0 %vm1772_vm0, %v1771_v7 }
 0x516   : > { %1630 = vmatprep.subr.bf16.mxu0 %v1771_v7 }
 0x519   : > { %1631 = vmatpush3.bf16.msra.mxu0 %v1862_v14 }
 0x51a   : > { %1632 = vmatprep.subr.bf16.mxu0 %v1771_v7 }
 0x51d   : > { %1633 = vmatpush3.bf16.msra.mxu0 %v1883_v22 }
 0x51e   : > { %1634 = vmatprep.subr.bf16.mxu0 %v1771_v7 }
 0x521   : > { %1635 = vmatpush3.bf16.msra.mxu0 %v1898_v28 }
 0x522   : > { %1636 = vmatprep.subr.bf16.mxu0 %v1771_v7 }
 0x525   : > { %1637 = vmatpush3.bf16.msra.mxu0 %v1912_v34 }
 0x526   : > { %1638 = vmatprep.subr.bf16.mxu0 %v1771_v7 }
 0x529   : > { %1639 = vmatpush3.bf16.msra.mxu0 %v1927_v40 }
 0x52a   : > { %1640 = vmatprep.subr.bf16.mxu0 %v1771_v7 }
 0x52d   : > { %1641 = vmatpush3.bf16.msra.mxu0 %v1942_v45  ;;  %v1722_v45 = vld [vmem:[%s2206_s4] sm:$0xff]  }
 0x52e   : > { %1642 = vmatprep.subr.bf16.mxu0 %v1771_v7 }
 0x531   : > { %1643 = vmatpush3.bf16.msra.mxu0 %v1955_v49  ;;  %v1723_v49 = vld [vmem:[%s2206_s4 + $0x8] sm:$0xff]  }
 0x5e7   : > { %v942_v10 = vpop.f32.mrb[24].mxu0 }
 0x5e8   : > { %v949_v14 = vadd.f32 %v942_v10, %v2036_v36  ;;  %v1606_v22 = vpop.f32.mrb[25].mxu0  ;;  %v1726_v36 = vld [vmem:[%s2206_s4 + $0x20] sm:$0xff]  }
 0x5e9   : > { %v945_v28 = vpop.f32.mrb[26].mxu0 }
 0x5ea   : > { %1750 = vtanh.f32 %v949_v14  ;;  %v950_v34 = vadd.f32 %v2034_v35, %v945_v28  ;;  %v1607_v19 = vpop.f32.mrb[27].mxu0 }
 0x5ec   : > { %1752 = vtanh.f32 %v950_v34 }
 0x5f4   : > { %v1751_v40 = vpop.eup %1750 }
 0x5f5   : > { %1300 = vst [vmem:[%s1830_s12 + $0x50] sm:$0xff] %v1751_v40 }
 0x5f6   : > { %v1753_v20 = vpop.eup %1752 }
 0x5f7   : > { %1301 = vst [vmem:[%s1830_s12 + $0x58] sm:$0xff] %v1753_v20  ;;  %v959_v21 = vpack.c.bf16 %v1753_v20, %v1751_v40 }
 0x5f9   : > { %1625 = vmatmul.mubr.bf16.vlgmr.msra.gmra.mrb[12].mxu1 %v959_v21 }
 0x5fa   : > { %1664 = vmatprep.mubr.msk.bf16.mxu1 %vm1772_vm0, %v1771_v7  ;;  %1649 = vmatpush3.bf16.msra.mxu1 %v1722_v45 }
 0x5fb   : > { %1650 = vmatprep.subr.bf16.mxu1 %v1771_v7 }
 0x5fe   : > { %1651 = vmatpush3.bf16.msra.mxu1 %v1723_v49 }
 0x5ff   : > { %1652 = vmatprep.subr.bf16.mxu1 %v1771_v7 }
 0x602   : > { %1653 = vmatpush3.bf16.msra.mxu1 %v1724_v23 }
 0x603   : > { %1654 = vmatprep.subr.bf16.mxu1 %v1771_v7 }
 0x606   : > { %1655 = vmatpush3.bf16.msra.mxu1 %v1725_v24 }
 0x607   : > { %1656 = vmatprep.subr.bf16.mxu1 %v1771_v7 }
 0x60a   : > { %1657 = vmatpush3.bf16.msra.mxu1 %v1726_v36 }
 0x60b   : > { %1658 = vmatprep.subr.bf16.mxu1 %v1771_v7 }
 0x6cc   : > { %v994_v25 = vpop.f32.mrb[12].mxu1 }
 0x6cd   : > { %v1001_v26 = vadd.f32 %v994_v25, %v2042_v38  ;;  %v1626_v27 = vpop.f32.mrb[13].mxu1  ;;  %v1727_v38 = vld [vmem:[%s2206_s4 + $0x28] sm:$0xff]  }
 0x6ce   : > { %v997_v29 = vpop.f32.mrb[14].mxu1  ;;  %1659 = vmatpush3.bf16.msra.mxu1 %v1727_v38 }
 0x6cf   : > { %1754 = vtanh.f32 %v1001_v26  ;;  %v1002_v30 = vadd.f32 %v2040_v37, %v997_v29  ;;  %v1627_v31 = vpop.f32.mrb[15].mxu1  ;;  %1660 = vmatprep.subr.bf16.mxu1 %v1771_v7  ;;  %v1728_v37 = vld [vmem:[%s2206_s4 + $0x30] sm:$0xff]  }
 0x6d1   : > { %1756 = vtanh.f32 %v1002_v30 }
 0x6d2   : > { %1661 = vmatpush3.bf16.msra.mxu1 %v1728_v37 }
 0x6d3   : > { %1662 = vmatprep.subr.bf16.mxu1 %v1771_v7 }
 0x6d6   : > { %1663 = vmatpush3.bf16.msra.mxu1 %v1729_v42 }
 0x6d9   : > { %v1755_v32 = vpop.eup %1754 }
 0x6da   : > { %1302 = vst [vmem:[%s1830_s12 + $0x60] sm:$0xff] %v1755_v32 }
 0x6db   : > { %v1757_v33 = vpop.eup %1756 }
 0x6dc   : > { %1303 = vst [vmem:[%s1830_s12 + $0x68] sm:$0xff] %v1757_v33  ;;  %v1011_v35 = vpack.c.bf16 %v1757_v33, %v1755_v32 }
 0x6de   : > { %1645 = vmatmul.mubr.bf16.vlgmr.msra.gmra.mrb[28].mxu0 %v1011_v35 }
 0x7b1   : > { %v1046_v43 = vpop.f32.mrb[28].mxu0 }
 0x7b2   : > { %v1053_v44 = vadd.f32 %v1046_v43, %v2048_v41  ;;  %v1646_v46 = vpop.f32.mrb[29].mxu0 }
 0x7b3   : > { %v1049_v47 = vpop.f32.mrb[30].mxu0 }
 0x7b4   : > { %1758 = vtanh.f32 %v1053_v44  ;;  %v1054_v48 = vadd.f32 %v2046_v39, %v1049_v47  ;;  %v1647_v50 = vpop.f32.mrb[31].mxu0 }
 0x7b6   : > { %1760 = vtanh.f32 %v1054_v48 }
 0x7be   : > { %v1759_v51 = vpop.eup %1758 }
 0x7bf   : > { %1304 = vst [vmem:[%s1830_s12 + $0x70] sm:$0xff] %v1759_v51  ;;  %1060 = vst [vmem:[#allocation2] sm:$0xff] %v1759_v51 }
 0x7c0   : > { %v1761_v52 = vpop.eup %1760 }
 0x7c1   : > { %1305 = vst [vmem:[%s1830_s12 + $0x78] sm:$0xff] %v1761_v52  ;;  %1061 = vst [vmem:[#allocation2 + $0x8] sm:$0xff] %v1761_v52  ;;  %v1062_v7 = vpack.c.bf16 %v1761_v52, %v1759_v51 }
 0x7c3   : > { %1665 = vmatmul.mubr.bf16.vlgmr.msra.gmra.mrb[16].mxu1 %v1062_v7 }
 0x896   : > { %v1168_v41 = vpop.f32.mrb[16].mxu1 }
 0x897   : > { %v1169_v54 = vadd.f32 %v1306_v53, %v1168_v41  ;;  %v1666_v55 = vpop.f32.mrb[17].mxu1 }
 0x898   : > { %v1171_v56 = vpop.f32.mrb[18].mxu1 }
 0x899   : > { %1175 = vst [vmem:[%s2209_s7] sm:$0xff] %v1169_v54  ;;  %v1172_v39 = vadd.f32 %v1306_v53, %v1171_v56  ;;  %v1667_v57 = vpop.f32.mrb[19].mxu1 }
 0x89b   : > { %1176 = vst [vmem:[%s2209_s7 + $0x8] sm:$0xff] %v1172_v39 }
 0x89c PF: > { %s18_s24 = sadd.s32 1, %s1768_s24  }
 0x89d   : > { %p15_p6 = scmp.ge.s32.totalorder %s18_s24, 6  }
 0x89f   :  { %17 = sbr.rel (!%p15_p6) target bundleno = 1 (0x1), region = 100 }

</bundles_post_ra>
